<compile_context>
chip_gen: v7x
topology: tpu7x:2x2x1
jax: 0.10.0
libtpu: 0.0.40
codegen_flags: <defaults>
</compile_context>

<pallas_src>
import functools
import math

import jax
import jax.numpy as jnp
from jax.experimental import pallas as pl
from jax.experimental.pallas import tpu as pltpu

_HALF_LOG_2PI = 0.5 * math.log(2.0 * math.pi)


def _pick_vmem_limit() -> int:
    """Per-generation VMEM budget: ~3/4 of physical capacity, capped at 96 MiB."""
    try:
        cap = int(pltpu.get_tpu_info().vmem_capacity_bytes)
        return min((cap * 3) // 4, 96 * 1024 * 1024)
    except Exception:  # not on a TPU (e.g. interpret mode) -> conservative value
        return 48 * 1024 * 1024


# ---------------------------------------------------------------------------
# Pallas kernels
# ---------------------------------------------------------------------------
def _log_prob_zero_mean_kernel(z_ref, w_ref, out_ref, *, log_norm_const, lane_out):
    """Independent(Normal(0, std), 1).log_prob for one (tb, Mp) tile.

    Mp = G*M lanes hold G batch rows.  w_ref is the (Mp, G) block-diagonal
    matrix carrying -0.5/var on its support, so the per-row reduction over the
    M latent dims is a single (otherwise-idle) MXU matmul and the epilogue is
    just `const + ssq`.  With lane packing (G > 1) the small (tb, G) result is
    transposed on the XLU so the store stream is lane-dense (G, tb).
    """
    z = z_ref[...]
    ssq = jnp.dot(z * z, w_ref[...], preferred_element_type=jnp.float32)  # (tb, G)
    if lane_out:
        out_ref[...] = log_norm_const + ssq.T      # (G, tb): unmasked vst stream
    else:
        out_ref[...] = log_norm_const + ssq        # G == 1 fallback: (tb, 1)


def _log_prob_kernel(z_ref, mean_ref, w_ref, out_ref, *, log_norm_const, lane_out):
    """General-mean variant (not used for the frozen zero-mean prior)."""
    d = z_ref[...] - mean_ref[...]
    ssq = jnp.dot(d * d, w_ref[...], preferred_element_type=jnp.float32)
    if lane_out:
        out_ref[...] = log_norm_const + ssq.T
    else:
        out_ref[...] = log_norm_const + ssq


def _affine_kernel(eps_ref, mean_ref, std_ref, out_ref):
    """Reparameterized sample mean + std * eps (non-identity priors only)."""
    out_ref[...] = mean_ref[...] + std_ref[...] * eps_ref[...]


# ---------------------------------------------------------------------------
# Wrapper: the "GaussianPrior" module in JAX
# ---------------------------------------------------------------------------
class GaussianPrior:
    def __init__(self, M: int, block_rows: int = 8192):
        self.M = int(M)
        self.block_rows = int(block_rows)   # max batch-tile rows; sweep 2048-8192
        # nn.Parameter(torch.zeros(M)) / nn.Parameter(torch.ones(M)), frozen
        # (requires_grad=False) -> all derived constants are built once here.
        self.mean = jnp.zeros((self.M,), dtype=jnp.float32)
        self.std = jnp.ones((self.M,), dtype=jnp.float32)
        self._zero_mean = bool(jnp.all(self.mean == 0.0))
        self._identity = self._zero_mean and bool(jnp.all(self.std == 1.0))

        self._vmem_limit = _pick_vmem_limit()

        # lane packing: G batch rows share one 128-lane vreg row when M | 128.
        self.G = 128 // self.M if (self.M <= 128 and 128 % self.M == 0) else 1

        # hoisted per-row constant: -(sum(log std) + M/2 * log(2*pi))
        self._log_norm_const = float(
            -(jnp.sum(jnp.log(self.std)) + self.M * _HALF_LOG_2PI))

        self._w_cache = {}        # g -> (g*M, g) block-diagonal -0.5/var matrix
        self._affine_cache = {}   # g -> ((1, g*M) mean row, (1, g*M) std row)

    # ---- layout helpers ---------------------------------------------------
    def _packing(self, B: int) -> int:
        # lane packing only when it is a free reshape (no jnp.pad / slice copy)
        return self.G if (self.G > 1 and B % self.G == 0) else 1

    def _weights(self, g: int) -> jax.Array:
        w = self._w_cache.get(g)
        if w is None:
            neg_half_inv_var = -0.5 / (self.std * self.std)             # (M,)
            eye = jnp.eye(g, dtype=jnp.float32)
            # column j sums lanes [j*M, (j+1)*M), pre-scaled by -0.5/var
            w = (jnp.repeat(eye, self.M, axis=0)
                 * jnp.tile(neg_half_inv_var, g)[:, None])              # (g*M, g)
            self._w_cache[g] = w
        return w

    def _affine_rows(self, g: int):
        rows = self._affine_cache.get(g)
        if rows is None:
            rows = (jnp.tile(self.mean, g)[None, :],
                    jnp.tile(self.std, g)[None, :])                     # (1, g*M)
            self._affine_cache[g] = rows
        return rows

    def _geometry(self, bp: int, Mp: int):
        """Pick (tile_rows, n_tiles) for the packed (bp, Mp) batch."""
        # worst-case streaming kernel keeps ~4 live (tb, Mp) f32 tiles
        # (double-buffered input + output); keep 3x headroom in the budget.
        fit = max(128, self._vmem_limit // (3 * 4 * Mp * 4))
        # >= ~4 grid steps for large batches (v7x: 2 TCs + pipeline overlap)
        target = min(self.block_rows, fit, max(128, -(-bp // 4)))
        tb = -(-target // 128) * 128    # multiple of 128: (8,128)- and lane-clean
        if tb >= bp:
            return bp, 1                # single full-array tile
        return tb, -(-bp // tb)         # last block may be partial (Pallas clips)

    # ---- kernel-backed distribution ops ------------------------------------
    def log_prob(self, z: jax.Array) -> jax.Array:
        """z: (B, M) f32 -> (B,) f32 (Independent Normal log-prob)."""
        B, M = z.shape
        assert M == self.M
        g = self._packing(B)
        Mp, bp = g * M, B // g
        zp = z.reshape(bp, Mp)                   # free row-major relabel, no pad
        tb, n_tiles = self._geometry(bp, Mp)
        w = self._weights(g)
        lane_out = g > 1

        z_spec = pl.BlockSpec((tb, Mp), lambda i: (i, 0))
        w_spec = pl.BlockSpec((Mp, g), lambda i: (0, 0))
        if self._zero_mean:
            kernel = functools.partial(_log_prob_zero_mean_kernel,
                                       log_norm_const=self._log_norm_const,
                                       lane_out=lane_out)
            in_specs = [z_spec, w_spec]
            operands = (zp, w)
        else:
            kernel = functools.partial(_log_prob_kernel,
                                       log_norm_const=self._log_norm_const,
                                       lane_out=lane_out)
            in_specs = [z_spec, pl.BlockSpec((1, Mp), lambda i: (0, 0)), w_spec]
            operands = (zp, self._affine_rows(g)[0], w)

        if lane_out:
            out_shape = jax.ShapeDtypeStruct((g, bp), jnp.float32)
            out_spec = pl.BlockSpec((g, tb), lambda i: (0, i))
        else:
            out_shape = jax.ShapeDtypeStruct((bp, 1), jnp.float32)
            out_spec = pl.BlockSpec((tb, 1), lambda i: (i, 0))

        out = pl.pallas_call(
            kernel,
            out_shape=out_shape,
            grid_spec=pltpu.PrefetchScalarGridSpec(
                num_scalar_prefetch=0,
                grid=(n_tiles,),
                in_specs=in_specs,
                out_specs=out_spec,
            ),
            compiler_params=pltpu.CompilerParams(
                dimension_semantics=("parallel",),
                vmem_limit_bytes=self._vmem_limit,
            ),
            cost_estimate=pl.CostEstimate(
                flops=int(bp * Mp * (1 + 2 * g)),
                transcendentals=0,
                bytes_accessed=int(4 * (bp * Mp + Mp * g + bp * g)),
            ),
        )(*operands)
        res = out.T if lane_out else out         # tiny (4*B-byte) layout fixup
        return res.reshape(B)

    def rsample(self, eps: jax.Array, *, force_kernel: bool = False) -> jax.Array:
        """eps: (B, M) standard-normal noise -> (B, M) reparameterized samples."""
        B, M = eps.shape
        assert M == self.M
        if self._identity and not force_kernel:
            # mean=0, std=1 (frozen): the sample IS the noise; skip the kernel
            # launch and the HBM round trip entirely.
            return eps
        g = self._packing(B)
        Mp, bp = g * M, B // g
        ep = eps.reshape(bp, Mp)                 # free row-major relabel, no pad
        tb, n_tiles = self._geometry(bp, Mp)
        mean_row, std_row = self._affine_rows(g)
        out = pl.pallas_call(
            _affine_kernel,
            out_shape=jax.ShapeDtypeStruct((bp, Mp), jnp.float32),
            grid_spec=pltpu.PrefetchScalarGridSpec(
                num_scalar_prefetch=0,
                grid=(n_tiles,),
                in_specs=[
                    pl.BlockSpec((tb, Mp), lambda i: (i, 0)),
                    pl.BlockSpec((1, Mp), lambda i: (0, 0)),
                    pl.BlockSpec((1, Mp), lambda i: (0, 0)),
                ],
                out_specs=pl.BlockSpec((tb, Mp), lambda i: (i, 0)),
            ),
            compiler_params=pltpu.CompilerParams(
                dimension_semantics=("parallel",),
                vmem_limit_bytes=self._vmem_limit,
            ),
            cost_estimate=pl.CostEstimate(
                flops=int(2 * bp * Mp),
                transcendentals=0,
                bytes_accessed=int(4 * (2 * bp * Mp + 2 * Mp)),
            ),
        )(ep, mean_row, std_row)
        return out.reshape(B, M)

    def sample(self, key, num_samples: int) -> jax.Array:
        """Draw (num_samples, M) samples from the prior.

        Noise comes from jax.random, so results are reproducible regardless of
        tiling (review correctness concern).
        # TODO(synk): pltpu.prng_seed/stateful_normal would avoid streaming eps
        # from HBM on hardware, but they have no interpret/CPU lowering and the
        # draw is EUP-bound anyway; jax.random noise + the identity-prior
        # short-circuit is used instead.
        """
        eps = jax.random.normal(key, (int(num_samples), self.M), dtype=jnp.float32)
        return self.rsample(eps)

    def forward(self):
        """Return the prior 'distribution'.

        # TODO(synk): torch.distributions.Independent/Normal has no Pallas
        # object equivalent; the distribution is represented by its parameters
        # plus the kernel-backed log_prob / rsample / sample ops.
        """
        return {"mean": self.mean, "std": self.std,
                "log_prob": self.log_prob, "rsample": self.rsample,
                "sample": self.sample}


# ---------------------------------------------------------------------------
# Pure-JAX reference for correctness
# ---------------------------------------------------------------------------
def _ref_log_prob(z, mean, std):
    elem = -0.5 * ((z - mean) / std) ** 2 - jnp.log(std) - _HALF_LOG_2PI
    return jnp.sum(elem, axis=-1)


if __name__ == "__main__":
    M = 32      # latent dimension
    B = 8       # batch of latent samples (lane-packed: 4 rows per vreg row)

    prior = GaussianPrior(M)
    dist = prior.forward()

    key = jax.random.PRNGKey(0)
    k_z, k_eps, k_s = jax.random.split(key, 3)
    z = jax.random.normal(k_z, (B, M), dtype=jnp.float32)
    eps = jax.random.normal(k_eps, (B, M), dtype=jnp.float32)

    lp = dist["log_prob"](z)
    samp_fast = dist["rsample"](eps)                      # identity short-circuit
    samp_kernel = prior.rsample(eps, force_kernel=True)   # exercises affine kernel
    samp_draw = dist["sample"](k_s, B)
    jax.block_until_ready((lp, samp_fast, samp_kernel, samp_draw))

    mean_b, std_b = prior.mean[None, :], prior.std[None, :]
    lp_ref = _ref_log_prob(z, mean_b, std_b)
    assert lp.shape == (B,), lp.shape
    assert jnp.allclose(lp, lp_ref, atol=1e-4, rtol=1e-4), (lp, lp_ref)
    assert samp_fast.shape == (B, M) and bool(jnp.all(samp_fast == eps))
    assert jnp.allclose(samp_kernel, mean_b + std_b * eps, atol=1e-6, rtol=1e-6)
    assert samp_draw.shape == (B, M) and bool(jnp.all(jnp.isfinite(samp_draw)))

    # non-lane-packable batch (B % G != 0): G=1 fallback, no padding, no slicing
    z_odd = jax.random.normal(k_z, (B + 1, M), dtype=jnp.float32)
    lp_odd = prior.log_prob(z_odd)
    # larger batch: multi-tile grid with a partial last block (no jnp.pad copy)
    z_big = jax.random.normal(k_eps, (1000, M), dtype=jnp.float32)
    lp_big = prior.log_prob(z_big)
    jax.block_until_ready((lp_odd, lp_big))
    assert jnp.allclose(lp_odd, _ref_log_prob(z_odd, mean_b, std_b),
                        atol=1e-4, rtol=1e-4)
    assert jnp.allclose(lp_big, _ref_log_prob(z_big, mean_b, std_b),
                        atol=1e-4, rtol=1e-4)

    print("KERNEL_OK")
</pallas_src>

<mosaic_0001>
module attributes {stable_mosaic.version = 11 : i64} {
  func.func @_log_prob_zero_mean_kernel(%arg0: i32, %arg1: memref<2x128xf32, #tpu.memory_space<vmem>>, %arg2: memref<128x4xf32, #tpu.memory_space<vmem>>, %arg3: memref<4x2xf32, #tpu.memory_space<vmem>>) attributes {dimension_semantics = [#tpu.dimension_semantics<parallel>], iteration_bounds = array<i64: 1>, scalar_prefetch = 0 : i64, scratch_operands = 0 : i64, tpu.core_type = #tpu.core_type<tc>, window_params = [{transform_indices = @transform_0, window_bounds = array<i64: 2, 128>}, {pipeline_mode = #tpu.pipeline_mode<synchronous>, transform_indices = @transform_1, window_bounds = array<i64: 128, 4>}, {transform_indices = @transform_2, window_bounds = array<i64: 4, 2>}]} {
    %c0 = arith.constant 0 : index
    %c0_0 = arith.constant 0 : index
    %0 = vector.load %arg1[%c0, %c0_0] : memref<2x128xf32, #tpu.memory_space<vmem>>, vector<2x128xf32>
    %1 = arith.mulf %0, %0 : vector<2x128xf32>
    %c0_1 = arith.constant 0 : index
    %c0_2 = arith.constant 0 : index
    %2 = vector.load %arg2[%c0_1, %c0_2] : memref<128x4xf32, #tpu.memory_space<vmem>>, vector<128x4xf32>
    %cst = arith.constant dense<0.000000e+00> : vector<2x4xf32>
    %3 = tpu.matmul %1, %2, %cst {dimension_numbers = #tpu.dot_dimension_numbers<[1], [0], [0], [1], [0, 0, 1, 1], [], []>} : vector<2x128xf32>, vector<128x4xf32>, vector<2x4xf32> -> vector<2x4xf32>
    %4 = tpu.transpose %3, [1, 0] : vector<2x4xf32> -> vector<4x2xf32>
    %cst_3 = arith.constant -29.4060326 : f32
    %5 = vector.broadcast %cst_3 : f32 to vector<4x2xf32>
    %6 = arith.addf %5, %4 : vector<4x2xf32>
    %c0_4 = arith.constant 0 : index
    %c0_5 = arith.constant 0 : index
    %7 = vector.load %arg3[%c0_4, %c0_5] : memref<4x2xf32, #tpu.memory_space<vmem>>, vector<4x2xf32>
    tpu.vector_store %arg3[%c0_4, %c0_5], %6 {strides = array<i32>} : memref<4x2xf32, #tpu.memory_space<vmem>>, vector<4x2xf32>,
    return
  }
  func.func @transform_0(%arg0: i32) -> (i32, i32) {
    %c0_i32 = arith.constant 0 : i32
    %c0_i32_0 = arith.constant 0 : i32
    return %arg0, %c0_i32 : i32, i32
  }
  func.func @transform_1(%arg0: i32) -> (i32, i32) {
    %c0_i32 = arith.constant 0 : i32
    %c0_i32_0 = arith.constant 0 : i32
    %c0_i32_1 = arith.constant 0 : i32
    return %c0_i32, %c0_i32_0 : i32, i32
  }
  func.func @transform_2(%arg0: i32) -> (i32, i32) {
    %c0_i32 = arith.constant 0 : i32
    %c0_i32_0 = arith.constant 0 : i32
    return %c0_i32, %arg0 : i32, i32
  }
}

</mosaic_0001>

<bundles_post_ra>
// kernel: tpu_custom_call.1
= control target key start
LH: loop header
LB: loop body
LE: loop exit
PB: predicated region body
PF: predicated region fallthrough
CT: control target
= control target key end

     0   :  { %v217_v0 = vmov 0.0|0.0   ;;  %vm218_vm0 = vmmov 0   ;;  %v219_v4 = vmov 0.0   ;;  %vm132_vm1 = vcmask 11264   ;;  %s289_s1 = inlined_call_operand.vmem [shape: f32[128,4], index: 1, kind: input, shape index: {}]   ;;  %s290_s0 = inlined_call_operand.vmem [shape: f32[2,128], index: 0, kind: input, shape index: {}]   ;;  %s291_s2 = inlined_call_operand.vmem [shape: f32[4,2], index: 2, kind: output, shape index: {}]  }
   0x1   :  { %190 = vmatprep.subr.bf16.mxu0 %v217_v0  ;;  %v13_v1 = vld [vmem:[%s289_s1] sm:$0xff]  ;;  %v14_v2 = vld [vmem:[%s289_s1 + $0x8] sm:$0xff]  ;;  %v15_v3 = vld [vmem:[%s289_s1 + $0x10] sm:$0xff]  ;;  %187 = vmatprep.mubr.msk.f32.mxu0 %vm218_vm0, %v219_v4 }
   0x2   :  { %v191_v5 = vpack.c.bf16 %v14_v2, %v13_v1  ;;  %v16_v6 = vld [vmem:[%s289_s1 + $0x18] sm:$0xff]  ;;  %v17_v8 = vld [vmem:[%s289_s1 + $0x20] sm:$0xff]  ;;  %v18_v9 = vld [vmem:[%s289_s1 + $0x28] sm:$0xff] }
   0x3   :  { %v194_v7 = vpack.c.bf16 %v16_v6, %v15_v3  ;;  %v197_v10 = vpack.c.bf16 %v18_v9, %v17_v8  ;;  %v19_v11 = vld [vmem:[%s289_s1 + $0x30] sm:$0xff]  ;;  %v20_v12 = vld [vmem:[%s289_s1 + $0x38] sm:$0xff]  ;;  %v21_v14 = vld [vmem:[%s289_s1 + $0x40] sm:$0xff] }
   0x4   :  { %192 = vmatpush3.bf16.msra.mxu0 %v191_v5  ;;  %v200_v13 = vpack.c.bf16 %v20_v12, %v19_v11  ;;  %v22_v15 = vld [vmem:[%s289_s1 + $0x48] sm:$0xff]  ;;  %v23_v17 = vld [vmem:[%s289_s1 + $0x50] sm:$0xff]  ;;  %v24_v18 = vld [vmem:[%s289_s1 + $0x58] sm:$0xff] }
   0x5   :  { %193 = vmatprep.subr.bf16.mxu0 %v217_v0  ;;  %v203_v16 = vpack.c.bf16 %v22_v15, %v21_v14  ;;  %v206_v19 = vpack.c.bf16 %v24_v18, %v23_v17  ;;  %v25_v20 = vld [vmem:[%s289_s1 + $0x60] sm:$0xff]  ;;  %v26_v21 = vld [vmem:[%s289_s1 + $0x68] sm:$0xff]  ;;  %v27_v23 = vld [vmem:[%s289_s1 + $0x70] sm:$0xff] }
   0x6   :  { %v209_v22 = vpack.c.bf16 %v26_v21, %v25_v20  ;;  %v28_v24 = vld [vmem:[%s289_s1 + $0x78] sm:$0xff]  ;;  %v11_v26 = vld [vmem:[%s290_s0] sm:$0x3] }
   0x7   :  { %v212_v25 = vpack.c.bf16 %v28_v24, %v27_v23  ;;  %v12_v27 = vmul.f32 %v11_v26, %v11_v26 }
   0x8   :  { %195 = vmatpush3.bf16.msra.mxu0 %v194_v7 }
   0x9   :  { %196 = vmatprep.subr.bf16.mxu0 %v217_v0 }
   0xc   :  { %198 = vmatpush3.bf16.msra.mxu0 %v197_v10 }
   0xd   :  { %199 = vmatprep.subr.bf16.mxu0 %v217_v0 }
  0x10   :  { %201 = vmatpush3.bf16.msra.mxu0 %v200_v13 }
  0x11   :  { %202 = vmatprep.subr.bf16.mxu0 %v217_v0 }
  0x14   :  { %204 = vmatpush3.bf16.msra.mxu0 %v203_v16 }
  0x15   :  { %205 = vmatprep.subr.bf16.mxu0 %v217_v0 }
  0x18   :  { %207 = vmatpush3.bf16.msra.mxu0 %v206_v19 }
  0x19   :  { %208 = vmatprep.subr.bf16.mxu0 %v217_v0 }
  0x1c   :  { %210 = vmatpush3.bf16.msra.mxu0 %v209_v22 }
  0x1d   :  { %211 = vmatprep.subr.bf16.mxu0 %v217_v0 }
  0x20   :  { %213 = vmatpush3.bf16.msra.mxu0 %v212_v25 }
  0x23   :  { %188 = vmatmul.mubr.f32.vlgmr.msra.gmra.mrb[0].mxu0 %v12_v27 }
  0xf6   :  { %v95_v28 = vpop.f32.mrb[0].mxu0 }
  0xf7   :  { %99 = vxpose.xlu0.b32.start.end [1/1] (short) (narrow) %v95_v28, 8  ;;  %v189_v29 = vpop.f32.mrb[1].mxu0 }
 0x177   :  { %v115_v30 = vpop.trf.xlu0 }
 0x178   :  { %v131_v31 = vadd.f32 -29.406033, %v115_v30 }
 0x17a   :  { %133 = vst.msk [vmem:[%s291_s2] sm:$0xf] %vm132_vm1, %v131_v31 }

</bundles_post_ra>
